<compile_context>
chip_gen: v7x
topology: tpu7x:2x2x1
jax: 0.10.0
libtpu: 0.0.40
codegen_flags: <defaults>
</compile_context>

<pallas_src>
import jax
import jax.numpy as jnp
from jax.experimental import pallas as pl
from jax.experimental.pallas import tpu as pltpu


def _round_up(n, m):
    return ((n + m - 1) // m) * m


def nodenet_kernel(x_ref, w1_ref, b1_ref, w2_ref, b2_ref, o_ref):
    # x_ref: (TB, 1)   w1_ref: (1, Hp)   b1_ref: (1, Hp)
    # w2_ref: (Hp, Dp) b2_ref: (1, Dp)   o_ref: (TB, Dp)
    x = x_ref[...]
    # Layer 1 (K=1 contraction) on the VPU: broadcast FMA + ReLU, MXU stays free.
    h = jnp.maximum(x * w1_ref[...] + b1_ref[...], 0.0)          # (TB, Hp)
    # Layer 2 on the MXU with f32 accumulation.
    y = jnp.dot(h, w2_ref[...], preferred_element_type=jnp.float32) + b2_ref[...]
    o_ref[...] = y.astype(o_ref.dtype)


def nodenet_forward(x, w1, b1, w2, b2, *, block_b=256):
    """y = relu(x @ w1 + b1) @ w2 + b2  (PyTorch nn.Linear semantics, weights pre-transposed)."""
    B = x.shape[0]
    H = w1.shape[1]
    D = w2.shape[1]

    # Lane/sublane-friendly zero padding. Exact: padded hidden units give
    # relu(0*x + 0) = 0 and padded W2 rows / output columns contribute 0.
    Hp = _round_up(H, 128)
    Dp = _round_up(D, 128)
    w1p = jnp.zeros((1, Hp), w1.dtype).at[:, :H].set(w1)
    b1p = jnp.zeros((1, Hp), b1.dtype).at[:, :H].set(b1)
    w2p = jnp.zeros((Hp, Dp), w2.dtype).at[:H, :D].set(w2)
    b2p = jnp.zeros((1, Dp), b2.dtype).at[:, :D].set(b2)

    if B <= block_b:
        # Single block, no grid: whole arrays live in VMEM for one invocation.
        out = pl.pallas_call(
            nodenet_kernel,
            out_shape=jax.ShapeDtypeStruct((B, Dp), jnp.float32),
            in_specs=[pl.BlockSpec(memory_space=pltpu.MemorySpace.VMEM)] * 5,
            out_specs=pl.BlockSpec(memory_space=pltpu.MemorySpace.VMEM),
        )(x, w1p, b1p, w2p, b2p)
        return out[:, :D]

    # Large batch: tile B; weights are DMA'd once and stay resident (constant
    # index maps) while x/out stream through the auto-pipeline.
    Bp = _round_up(B, block_b)
    xp = jnp.zeros((Bp, 1), x.dtype).at[:B, :].set(x)
    out = pl.pallas_call(
        nodenet_kernel,
        out_shape=jax.ShapeDtypeStruct((Bp, Dp), jnp.float32),
        grid_spec=pltpu.PrefetchScalarGridSpec(
            num_scalar_prefetch=0,
            grid=(Bp // block_b,),
            in_specs=[
                pl.BlockSpec((block_b, 1), lambda i: (i, 0)),
                pl.BlockSpec((1, Hp), lambda i: (0, 0)),
                pl.BlockSpec((1, Hp), lambda i: (0, 0)),
                pl.BlockSpec((Hp, Dp), lambda i: (0, 0)),
                pl.BlockSpec((1, Dp), lambda i: (0, 0)),
            ],
            out_specs=pl.BlockSpec((block_b, Dp), lambda i: (i, 0)),
        ),
        compiler_params=pltpu.CompilerParams(
            dimension_semantics=("parallel",),   # shard batch across TCs on v7x
        ),
    )(xp, w1p, b1p, w2p, b2p)
    return out[:B, :D]


def init_params(key, hidden_dim, dim):
    # Mimic PyTorch nn.Linear default init scale (uniform +/- 1/sqrt(fan_in)).
    k1, k2, k3, k4 = jax.random.split(key, 4)
    bound1 = 1.0 / jnp.sqrt(1.0)
    w1 = jax.random.uniform(k1, (1, hidden_dim), jnp.float32, -bound1, bound1)
    b1 = jax.random.uniform(k2, (1, hidden_dim), jnp.float32, -bound1, bound1)
    bound2 = 1.0 / jnp.sqrt(float(hidden_dim))
    w2 = jax.random.uniform(k3, (hidden_dim, dim), jnp.float32, -bound2, bound2)
    b2 = jax.random.uniform(k4, (1, dim), jnp.float32, -bound2, bound2)
    return w1, b1, w2, b2


if __name__ == "__main__":
    # TODO(synk): training-side members of NodeNet (MSELoss, Adam, loss_list)
    # are not part of the forward pass and are not implemented here.
    key = jax.random.PRNGKey(0)
    kx, kp = jax.random.split(key)

    B = 8            # small batch of scalar latent-variable samples
    HIDDEN = 128     # hidden_dim (small stand-in for 1000)
    DIM = 16         # output Dim

    x = jax.random.normal(kx, (B, 1), jnp.float32)
    w1, b1, w2, b2 = init_params(kp, HIDDEN, DIM)

    # Small-batch (gridless) path.
    out = jax.block_until_ready(nodenet_forward(x, w1, b1, w2, b2))
    ref = jnp.maximum(x @ w1 + b1, 0.0) @ w2 + b2
    assert out.shape == (B, DIM)
    assert jnp.allclose(out, ref, atol=1e-4, rtol=1e-5)

    # Batch-tiled (grid) path with VMEM-resident weights.
    B2 = 512
    x2 = jax.random.normal(jax.random.PRNGKey(1), (B2, 1), jnp.float32)
    out2 = jax.block_until_ready(nodenet_forward(x2, w1, b1, w2, b2, block_b=128))
    ref2 = jnp.maximum(x2 @ w1 + b1, 0.0) @ w2 + b2
    assert out2.shape == (B2, DIM)
    assert jnp.allclose(out2, ref2, atol=1e-4, rtol=1e-5)

    print("KERNEL_OK")
</pallas_src>

<mosaic_0001>
module attributes {stable_mosaic.version = 11 : i64} {
  func.func @nodenet_kernel(%arg0: memref<8x1xf32, #tpu.memory_space<vmem>>, %arg1: memref<1x128xf32, #tpu.memory_space<vmem>>, %arg2: memref<1x128xf32, #tpu.memory_space<vmem>>, %arg3: memref<128x128xf32, #tpu.memory_space<vmem>>, %arg4: memref<1x128xf32, #tpu.memory_space<vmem>>, %arg5: memref<8x128xf32, #tpu.memory_space<vmem>>) attributes {dimension_semantics = [], scalar_prefetch = 0 : i64, scratch_operands = 0 : i64, tpu.core_type = #tpu.core_type<tc>} {
    %c0 = arith.constant 0 : index
    %c0_0 = arith.constant 0 : index
    %0 = vector.load %arg0[%c0, %c0_0] : memref<8x1xf32, #tpu.memory_space<vmem>>, vector<8x1xf32>
    %c0_1 = arith.constant 0 : index
    %c0_2 = arith.constant 0 : index
    %1 = vector.load %arg1[%c0_1, %c0_2] : memref<1x128xf32, #tpu.memory_space<vmem>>, vector<1x128xf32>
    %2 = vector.broadcast %0 : vector<8x1xf32> to vector<8x128xf32>
    %3 = vector.broadcast %1 : vector<1x128xf32> to vector<8x128xf32>
    %4 = arith.mulf %2, %3 : vector<8x128xf32>
    %c0_3 = arith.constant 0 : index
    %c0_4 = arith.constant 0 : index
    %5 = vector.load %arg2[%c0_3, %c0_4] : memref<1x128xf32, #tpu.memory_space<vmem>>, vector<1x128xf32>
    %6 = vector.broadcast %5 : vector<1x128xf32> to vector<8x128xf32>
    %7 = arith.addf %4, %6 : vector<8x128xf32>
    %cst = arith.constant 0.000000e+00 : f32
    %8 = vector.broadcast %cst : f32 to vector<8x128xf32>
    %9 = arith.maximumf %7, %8 : vector<8x128xf32>
    %c0_5 = arith.constant 0 : index
    %c0_6 = arith.constant 0 : index
    %10 = vector.load %arg3[%c0_5, %c0_6] : memref<128x128xf32, #tpu.memory_space<vmem>>, vector<128x128xf32>
    %cst_7 = arith.constant dense<0.000000e+00> : vector<8x128xf32>
    %11 = tpu.matmul %9, %10, %cst_7 {dimension_numbers = #tpu.dot_dimension_numbers<[1], [0], [0], [1], [0, 0, 1, 1], [], []>} : vector<8x128xf32>, vector<128x128xf32>, vector<8x128xf32> -> vector<8x128xf32>
    %c0_8 = arith.constant 0 : index
    %c0_9 = arith.constant 0 : index
    %12 = vector.load %arg4[%c0_8, %c0_9] : memref<1x128xf32, #tpu.memory_space<vmem>>, vector<1x128xf32>
    %13 = vector.broadcast %12 : vector<1x128xf32> to vector<8x128xf32>
    %14 = arith.addf %11, %13 : vector<8x128xf32>
    %c0_10 = arith.constant 0 : index
    %c0_11 = arith.constant 0 : index
    %15 = vector.load %arg5[%c0_10, %c0_11] : memref<8x128xf32, #tpu.memory_space<vmem>>, vector<8x128xf32>
    tpu.vector_store %arg5[%c0_10, %c0_11], %14 {strides = array<i32>} : memref<8x128xf32, #tpu.memory_space<vmem>>, vector<8x128xf32>,
    return
  }
}

</mosaic_0001>

<bundles_post_ra>
// kernel: tpu_custom_call.1
= control target key start
LH: loop header
LB: loop body
LE: loop exit
PB: predicated region body
PF: predicated region fallthrough
CT: control target
= control target key end

     0   :  { %10 = vsyncpa [#allocation3], 0  ;;  %s377_s0 = inlined_call_operand.vmem [shape: f32[8,1], index: 0, kind: input, shape index: {}]   ;;  %s378_s1 = inlined_call_operand.vmem [shape: f32[1,128], index: 1, kind: input, shape index: {}]   ;;  %s379_s2 = inlined_call_operand.vmem [shape: f32[1,128], index: 2, kind: input, shape index: {}]   ;;  %s380_s3 = inlined_call_operand.hbm [shape: f32[128,128], index: 3, kind: input, shape index: {}]   ;;  %s381_s4 = inlined_call_operand.vmem [shape: f32[1,128], index: 4, kind: input, shape index: {}]   ;;  %s382_s5 = inlined_call_operand.hbm [shape: f32[8,128], index: 5, kind: output, shape index: {}]  }
   0x1   :  { %11 = vsyncpa [#allocation4], 0  ;;  %s303_s18 = smov [#allocation2]   ;;  %s255_s22 = scalar_lea.hbm %s380_s3, 2048 }
   0x2   :  { %s23_s19 = sshll.u32 %s303_s18, 4  ;;  %p256_p0 = scmp.ne.s32.totalorder %s380_s3, %s255_s22  ;;  %s24_s19 = int_to_ptr.vmem [resolvable:$true] %s23_s19 }
   0x3   :  { %p259_p1 = scmp.lt.u32.totalorder %s255_s22, %s380_s3 }
   0x5   :  { %p261_p2 = pnand %p259_p1, %p256_p0 }
   0x7   :  { %264 = shalt.err (!%p261_p2)
}
   0x8   :  { %s265_s27 = scalar_lea.vmem %s24_s19, 2048  ;;  %p270_p4 = scmp.lt.s32.totalorder %s24_s19, %s24_s19 }
   0x9   :  { %p266_p3 = scmp.ne.s32.totalorder %s24_s19, %s265_s27  ;;  %p271_p5 = scmp.lt.s32.totalorder %s265_s27, %s265_s27 }
   0xb   :  { %p272_p6 = por %p271_p5, %p270_p4 }
   0xd   :  { %p273_p7 = pnand %p272_p6, %p266_p3 }
   0xf   :  { %276 = shalt.err (!%p273_p7)
}
  0x10   :  { %s304_s28 = smov 128   ;;  %s305_s29 = smov 8  }
  0x11   :  { %29 = dma.hbm_to_vmem [thread:$0]  %s380_s3, 2048, %s24_s19, [#allocation3], %s304_s28, %s304_s28, %s305_s29  }
  0x12   :  { %299 = dma.done.wait [#allocation3], 2048  }
  0x13   :  { %300 = vsyncadd [#allocation3], 4294965248  ;;  %v306_v0 = vmov 0   ;;  %v307_v1 = vmov 0.0|0.0   ;;  %v35_v2 = vld [vmem:[%s377_s0] sm:$0xff]  ;;  %v59_v4 = vld [vmem:[#allocation2 + $0x8] sm:$0xff] }
  0x14   :  { %254 = vset.pattern.permute.xlu0 %v306_v0  ;;  %222 = vmatprep.subr.bf16.mxu0 %v307_v1  ;;  %v58_v3 = vld [vmem:[#allocation2] sm:$0xff]  ;;  %v60_v6 = vld [vmem:[#allocation2 + $0x10] sm:$0xff]  ;;  %v61_v7 = vld [vmem:[#allocation2 + $0x18] sm:$0xff]  ;;  %vm308_vm0 = vmmov 0   ;;  %v309_v12 = vmov 0.0   ;;  %s310_s13 = smov [#allocation5]  }
  0x15   :  { %39 = vperm.xlu0 %254, %v35_v2   ;;  %v223_v5 = vpack.c.bf16 %v59_v4, %v58_v3  ;;  %v226_v8 = vpack.c.bf16 %v61_v7, %v60_v6  ;;  %v62_v9 = vld [vmem:[#allocation2 + $0x20] sm:$0xff]  ;;  %v63_v10 = vld [vmem:[#allocation2 + $0x28] sm:$0xff]  ;;  %219 = vmatprep.mubr.msk.f32.mxu0 %vm308_vm0, %v309_v12  ;;  %v64_v13 = vld [vmem:[#allocation2 + $0x30] sm:$0xff]  ;;  %s158_s14 = sshll.u32 %s310_s13, 4  ;;  %s159_s14 = int_to_ptr.vmem [resolvable:$true] %s158_s14 }
  0x16   :  { %v229_v11 = vpack.c.bf16 %v63_v10, %v62_v9  ;;  %v65_v14 = vld [vmem:[#allocation2 + $0x38] sm:$0xff]  ;;  %v66_v16 = vld [vmem:[#allocation2 + $0x40] sm:$0xff]  ;;  %v67_v17 = vld [vmem:[#allocation2 + $0x48] sm:$0xff]  ;;  %p282_p9 = scmp.lt.s32.totalorder %s159_s14, %s159_s14 }
  0x17   :  { %224 = vmatpush3.bf16.msra.mxu0 %v223_v5  ;;  %v232_v15 = vpack.c.bf16 %v65_v14, %v64_v13  ;;  %v235_v18 = vpack.c.bf16 %v67_v17, %v66_v16  ;;  %v68_v19 = vld [vmem:[#allocation2 + $0x50] sm:$0xff]  ;;  %v69_v20 = vld [vmem:[#allocation2 + $0x58] sm:$0xff]  ;;  %v70_v22 = vld [vmem:[#allocation2 + $0x60] sm:$0xff] }
  0x18   :  { %225 = vmatprep.subr.bf16.mxu0 %v307_v1  ;;  %v238_v21 = vpack.c.bf16 %v69_v20, %v68_v19  ;;  %v71_v23 = vld [vmem:[#allocation2 + $0x68] sm:$0xff]  ;;  %v72_v25 = vld [vmem:[#allocation2 + $0x70] sm:$0xff]  ;;  %v73_v26 = vld [vmem:[#allocation2 + $0x78] sm:$0xff] }
  0x19   :  { %v241_v24 = vpack.c.bf16 %v71_v23, %v70_v22  ;;  %v244_v27 = vpack.c.bf16 %v73_v26, %v72_v25  ;;  %v167_v28 = vld [vmem:[%s378_s1] ss:$0 sm:$0xff]  ;;  %s277_s1 = scalar_lea.vmem %s159_s14, 128 }
  0x1a   :  { %v168_v29 = vld [vmem:[%s379_s2] ss:$0 sm:$0xff]  ;;  %p278_p8 = scmp.ne.s32.totalorder %s159_s14, %s277_s1  ;;  %p283_p10 = scmp.lt.s32.totalorder %s277_s1, %s277_s1 }
  0x1b   :  { %227 = vmatpush3.bf16.msra.mxu0 %v226_v8  ;;  %v169_v34 = vld [vmem:[%s381_s4] ss:$0 sm:$0xff] }
  0x1c   :  { %228 = vmatprep.subr.bf16.mxu0 %v307_v1  ;;  %p284_p11 = por %p283_p10, %p282_p9 }
  0x1e   :  { %p285_p12 = pnand %p284_p11, %p278_p8 }
  0x1f   :  { %230 = vmatpush3.bf16.msra.mxu0 %v229_v11 }
  0x20   :  { %231 = vmatprep.subr.bf16.mxu0 %v307_v1 }
  0x23   :  { %233 = vmatpush3.bf16.msra.mxu0 %v232_v15 }
  0x24   :  { %234 = vmatprep.subr.bf16.mxu0 %v307_v1 }
  0x27   :  { %236 = vmatpush3.bf16.msra.mxu0 %v235_v18 }
  0x28   :  { %237 = vmatprep.subr.bf16.mxu0 %v307_v1 }
  0x2b   :  { %239 = vmatpush3.bf16.msra.mxu0 %v238_v21 }
  0x2c   :  { %240 = vmatprep.subr.bf16.mxu0 %v307_v1 }
  0x2f   :  { %242 = vmatpush3.bf16.msra.mxu0 %v241_v24 }
  0x30   :  { %243 = vmatprep.subr.bf16.mxu0 %v307_v1 }
  0x33   :  { %245 = vmatpush3.bf16.msra.mxu0 %v244_v27 }
  0x94   :  { %v40_v30 = vpop.permute.xlu0 %39 }
  0x95   :  { %v48_v31 = vmul.f32 %v167_v28, %v40_v30 }
  0x97   :  { %v56_v32 = vadd.f32 %v168_v29, %v48_v31 }
  0x99   :  { %v57_v33 = vmax.f32 %v56_v32, 0.0 }
  0x9b   :  { %220 = vmatmul.mubr.f32.vlgmr.msra.gmra.mrb[0].mxu0 %v57_v33 }
 0x16e   :  { %v147_v35 = vpop.f32.mrb[0].mxu0 }
 0x16f   :  { %v148_v36 = vadd.f32 %v169_v34, %v147_v35  ;;  %v221_v37 = vpop.f32.mrb[1].mxu0 }
 0x171   :  { %151 = vst [vmem:[#allocation5] sm:$0xff] %v148_v36 }
 0x172   :  { %288 = shalt.err (!%p285_p12)
}
 0x173   :  { %s289_s16 = scalar_lea.hbm %s382_s5, 128 }
 0x174   :  { %p290_p13 = scmp.ne.s32.totalorder %s382_s5, %s289_s16  ;;  %p293_p0 = scmp.lt.u32.totalorder %s289_s16, %s382_s5 }
 0x176   :  { %p295_p1 = pnand %p293_p0, %p290_p13 }
 0x178   :  { %298 = shalt.err (!%p295_p1)
}
 0x179   :  { %161 = dma.vmem_to_hbm [thread:$0]  %s159_s14, 128, %s382_s5, [#allocation4]  }
 0x17a   :  { %301 = dma.done.wait [#allocation4], 128  }
 0x17b   :  { %302 = vsyncadd [#allocation4], 4294967168 }
 0x17c   :  { %165 = vsyncpa [#allocation3], 1 }
 0x17d   :  { %166 = vsyncpa [#allocation4], 1 }

</bundles_post_ra>
